<compile_context>
chip_gen: v6e
topology: v6e:2x2x1
jax: 0.10.0
libtpu: 0.0.40
codegen_flags: <defaults>
</compile_context>

<pallas_src>
import jax
import jax.numpy as jnp
from jax.experimental import pallas as pl
from jax.experimental.pallas import tpu as pltpu

LEAKY_SLOPE = 0.01  # PyTorch nn.LeakyReLU default
BN_EPS = 1e-5


# ----------------------------------------------------------------------------
# Pallas kernel: fused multi-scale MLP (1x1 conv, folded BN) + LeakyReLU + max
# over the Ns neighbors, channel-major / lane-dense, neighbors batched on lanes.
# ----------------------------------------------------------------------------
def _make_fused_msg_kernel(meta, np_tile):
    """meta: tuple of (Ns, n_layers, c_off, c_out_last) per scale (static)."""

    def kernel(*refs):
        out_ref = refs[-1]                      # [Ctot, np_tile] f32
        in_refs = refs[:-1]
        pos = 0
        for (ns, n_layers, c_off, c_out) in meta:
            g_ref = in_refs[pos]                # [Cin, np_tile*Ns] bf16
            layer_refs = in_refs[pos + 1: pos + 1 + 2 * n_layers]
            pos += 1 + 2 * n_layers

            # One big matmul per layer: N = np_tile*Ns lanes per weight push.
            x = g_ref[...]
            for l in range(n_layers):
                w = layer_refs[2 * l][...]                  # bf16 [Cout_l, Cin_l]
                sh = layer_refs[2 * l + 1][...]             # f32  [Cout_l, 1]
                y = jnp.dot(w, x, preferred_element_type=jnp.float32)
                y = y + sh                                  # folded conv-bias/BN shift
                y = jnp.maximum(y, LEAKY_SLOPE * y)         # LeakyReLU (slope < 1)
                x = y.astype(jnp.bfloat16) if l + 1 < n_layers else y

            # Max over the Ns neighbors: contiguous column slices, pairwise VPU tree.
            segs = [x[:, n * np_tile:(n + 1) * np_tile] for n in range(ns)]
            while len(segs) > 1:
                nxt = [jnp.maximum(segs[i], segs[i + 1])
                       for i in range(0, len(segs) - 1, 2)]
                if len(segs) % 2:
                    nxt.append(segs[-1])
                segs = nxt
            out_ref[c_off:c_off + c_out, :] = segs[0]       # lane-dense store

    return kernel


# ----------------------------------------------------------------------------
# Tile / VMEM budgeting
# ----------------------------------------------------------------------------
def _physical_vmem_bytes():
    try:
        info = pltpu.get_tpu_info()
        for attr in ("vmem_capacity_bytes", "vmem_size_bytes", "vmem_bytes"):
            v = getattr(info, attr, None)
            if v:
                return int(v)
    except Exception:
        pass
    return 64 * 1024 * 1024  # conservative default (v7x physical VMEM)


def _estimate_vmem_need(scale_dims, ctot, np_tile):
    """scale_dims: list of (Ns, Cin, max_Cout). Rough per-grid-step VMEM footprint."""
    need = 0
    for (ns, cin, cmax) in scale_dims:
        need += 2 * cin * np_tile * ns * 2       # double-buffered bf16 grouped block
        need += 2 * cmax * np_tile * ns * 4      # f32 activation working set headroom
    need += 2 * ctot * np_tile * 4               # double-buffered f32 output block
    need += 2 << 20                              # params + compiler scratch slack
    return need


def _pick_np_tile(Np, B, scale_dims, ctot, phys_vmem):
    cands = [t for t in (512, 384, 256, 128) if Np % t == 0]
    if not cands:
        cands = [Np]                             # full extent (always legal)
    budget = int(phys_vmem * 0.6)
    chosen = None
    for t in cands:                              # descending: biggest tile that fits
        if _estimate_vmem_need(scale_dims, ctot, t) <= budget:
            chosen = t
            break
    if chosen is None:
        chosen = cands[-1]
    # v7x has 2 TensorCores: keep the parallel grid at >= 2 steps when possible.
    if B * (Np // chosen) < 2:
        for t in cands:
            if t < chosen and B * (Np // t) >= 2:
                chosen = t
                break
    return chosen


# ----------------------------------------------------------------------------
# Single fused pallas_call over all MSG scales
# ----------------------------------------------------------------------------
def msg_forward(grouped_list, params_list, Np, np_tile, phys_vmem):
    """grouped_list[i]: [B, Cin_i, Np*Ns_i] bf16 in (tile, neighbor, point) lane order.
    params_list[i]: [(wT bf16 [co,ci], shift f32 [co,1]), ...].
    Returns new_points [B, Np, sum(Cout_last)] f32."""
    B = grouped_list[0].shape[0]
    n_ptiles = Np // np_tile

    args, in_specs, meta, scale_dims = [], [], [], []
    c_off = 0
    for g, layers in zip(grouped_list, params_list):
        cin = g.shape[1]
        ns = g.shape[2] // Np
        args.append(g)
        in_specs.append(pl.BlockSpec((None, cin, np_tile * ns), lambda b, p: (b, 0, p)))
        # TODO(synk): single-buffer these grid-invariant param blocks (pipeline_mode).
        for (wT, shift) in layers:
            args += [wT, shift]
            in_specs += [pl.BlockSpec(wT.shape, lambda b, p: (0, 0)),
                         pl.BlockSpec(shift.shape, lambda b, p: (0, 0))]
        c_out = layers[-1][0].shape[0]
        cmax = max(w.shape[0] for (w, _) in layers)
        meta.append((ns, len(layers), c_off, c_out))
        scale_dims.append((ns, cin, cmax))
        c_off += c_out
    ctot = c_off

    need = _estimate_vmem_need(scale_dims, ctot, np_tile)
    vmem_limit = min(int(phys_vmem * 0.85), max(need + (8 << 20), 32 << 20))

    kernel = _make_fused_msg_kernel(tuple(meta), np_tile)
    out_cm = pl.pallas_call(
        kernel,
        out_shape=jax.ShapeDtypeStruct((B, ctot, Np), jnp.float32),
        grid=(B, n_ptiles),
        in_specs=in_specs,
        out_specs=pl.BlockSpec((None, ctot, np_tile), lambda b, p: (b, 0, p)),
        compiler_params=pltpu.CompilerParams(
            dimension_semantics=("parallel", "parallel"),
            vmem_limit_bytes=vmem_limit),
    )(*args)
    # PyTorch: cat over channels then permute(0, 2, 1) -> [B, Np, sum(Cout)]
    return jnp.transpose(out_cm, (0, 2, 1))


# ----------------------------------------------------------------------------
# Plain-JAX glue: FPS, ball query, channel-major gather into kernel layout
# ----------------------------------------------------------------------------
def index_points(points, idx):
    """points: [B, N, C], idx: [B, ...] int -> [B, ..., C]"""
    return jax.vmap(lambda p, i: p[i])(points, idx)


def square_distance(src, dst):
    dist = -2.0 * jnp.einsum("bnc,bmc->bnm", src, dst)
    dist = dist + jnp.sum(src ** 2, -1)[:, :, None]
    dist = dist + jnp.sum(dst ** 2, -1)[:, None, :]
    return dist


def farthest_point_sample(xyz, npoint):
    # Deterministic: start from index 0 instead of torch.randint.
    B, N, _ = xyz.shape

    def body(i, state):
        centroids, distance, farthest = state
        centroids = centroids.at[:, i].set(farthest)
        centroid = jnp.take_along_axis(xyz, farthest[:, None, None], axis=1)  # [B,1,3]
        dist = jnp.sum((xyz - centroid) ** 2, -1)
        distance = jnp.minimum(distance, dist)
        farthest = jnp.argmax(distance, axis=-1).astype(jnp.int32)
        return centroids, distance, farthest

    centroids = jnp.zeros((B, npoint), dtype=jnp.int32)
    distance = jnp.full((B, N), 1e10, dtype=jnp.float32)
    farthest = jnp.zeros((B,), dtype=jnp.int32)
    centroids, _, _ = jax.lax.fori_loop(0, npoint, body, (centroids, distance, farthest))
    return centroids


def ball_query(radius, nsample, xyz, new_xyz):
    B, N, _ = xyz.shape
    Np = new_xyz.shape[1]
    group_idx = jnp.broadcast_to(jnp.arange(N, dtype=jnp.int32), (B, Np, N))
    sqrdists = square_distance(new_xyz, xyz)
    group_idx = jnp.where(sqrdists > radius ** 2, N, group_idx)
    group_idx = jnp.sort(group_idx, axis=-1)[:, :, :nsample]
    group_first = jnp.broadcast_to(group_idx[:, :, 0:1], group_idx.shape)
    group_idx = jnp.where(group_idx == N, group_first, group_idx)
    return group_idx


def _group_channel_major(xyz_cm, pts_cm, new_xyz_cm, grouped_idx, np_tile):
    """Gather grouped features straight into kernel layout:
    [B, Cin, Np*Ns] bf16, flat last axis ordered (point_tile, neighbor, local_point)."""
    B, Cx, _ = xyz_cm.shape
    Np, Ns = grouped_idx.shape[1], grouped_idx.shape[2]
    n_pt = Np // np_tile
    idx = grouped_idx.reshape(B, n_pt, np_tile, Ns)
    idx = jnp.transpose(idx, (0, 1, 3, 2)).reshape(B, Np * Ns)          # (pt, n, p) order

    idx_x = jnp.broadcast_to(idx[:, None, :], (B, Cx, Np * Ns))
    g_xyz = jnp.take_along_axis(xyz_cm, idx_x, axis=2)                  # [B,3,Np*Ns] bf16

    cen = new_xyz_cm.reshape(B, Cx, n_pt, 1, np_tile)
    cen = jnp.broadcast_to(cen, (B, Cx, n_pt, Ns, np_tile)).reshape(B, Cx, Np * Ns)
    g_xyz = g_xyz - cen

    if pts_cm is None:
        return g_xyz
    D = pts_cm.shape[1]
    idx_p = jnp.broadcast_to(idx[:, None, :], (B, D, Np * Ns))
    g_pts = jnp.take_along_axis(pts_cm, idx_p, axis=2)                  # [B,D,Np*Ns]
    return jnp.concatenate([g_xyz, g_pts], axis=1)                      # [B,3+D,Np*Ns]


# ----------------------------------------------------------------------------
# The module
# ----------------------------------------------------------------------------
class PointnetSAMSG:
    def __init__(self, npoint, radius_list, nsample_list, in_channel, mlp_list, key):
        assert len(radius_list) == len(nsample_list) == len(mlp_list)
        self.npoint = npoint
        self.radius_list = radius_list
        self.nsample_list = nsample_list
        self.mlp_list = mlp_list
        self.in_channel = in_channel
        # Deterministic parameter init (Conv2d 1x1 weight+bias; BN folded in eval mode).
        # Stored per layer as (wT [cout, cin] bf16 with BN scale folded in, shift [cout,1] f32).
        self.params = []
        for mlp in mlp_list:
            layers = []
            cin = in_channel + 3
            for cout in mlp:
                key, k_w, k_b = jax.random.split(key, 3)
                w = jax.random.normal(k_w, (cin, cout), jnp.float32) * 0.1
                conv_bias = jax.random.normal(k_b, (cout,), jnp.float32) * 0.1
                gamma = jnp.ones((cout,), jnp.float32)
                beta = jnp.zeros((cout,), jnp.float32)
                run_mean = jnp.zeros((cout,), jnp.float32)
                run_var = jnp.ones((cout,), jnp.float32)
                bn_scale = gamma / jnp.sqrt(run_var + BN_EPS)
                # folded: BN(conv(x)+b) = x @ (W*scale) + ((b - mean)*scale + beta)
                w_folded = w * bn_scale[None, :]
                shift = (conv_bias - run_mean) * bn_scale + beta
                wT = jnp.transpose(w_folded).astype(jnp.bfloat16)       # [cout, cin]
                layers.append((wT, shift.reshape(cout, 1).astype(jnp.float32)))
                cin = cout
            self.params.append(layers)

    def __call__(self, xyz, points):
        B, N, C = xyz.shape
        Np = self.npoint
        fps_idx = farthest_point_sample(xyz, Np)
        new_xyz = index_points(xyz, fps_idx)                            # [B, Np, 3] f32

        # Channel-major bf16 sources: one small transpose/cast per input (not per slab).
        xyz_cm = jnp.transpose(xyz, (0, 2, 1)).astype(jnp.bfloat16)     # [B, 3, N]
        pts_cm = (None if points is None
                  else jnp.transpose(points, (0, 2, 1)).astype(jnp.bfloat16))
        new_xyz_cm = jnp.transpose(new_xyz, (0, 2, 1)).astype(jnp.bfloat16)  # [B, 3, Np]

        cin = 3 if points is None else 3 + points.shape[-1]
        scale_dims = [(self.nsample_list[i], cin, max(mlp))
                      for i, mlp in enumerate(self.mlp_list)]
        ctot = sum(mlp[-1] for mlp in self.mlp_list)
        phys_vmem = _physical_vmem_bytes()
        np_tile = _pick_np_tile(Np, B, scale_dims, ctot, phys_vmem)

        grouped_list = []
        for i, radius in enumerate(self.radius_list):
            ns = self.nsample_list[i]
            grouped_idx = ball_query(radius, ns, xyz, new_xyz)          # [B, Np, Ns]
            grouped_list.append(
                _group_channel_major(xyz_cm, pts_cm, new_xyz_cm, grouped_idx, np_tile))

        # All scales fused into one Pallas call -> [B, Np, sum(Cout_last)]
        new_points = msg_forward(grouped_list, self.params, Np, np_tile, phys_vmem)
        return new_xyz, new_points


if __name__ == "__main__":
    key = jax.random.PRNGKey(0)
    k_xyz, k_pts, k_param = jax.random.split(key, 3)

    B, N, D = 2, 32, 4
    npoint = 8
    radius_list = [0.3, 0.6]
    nsample_list = [8, 16]
    mlp_list = [[16, 32], [16, 32]]

    xyz = jax.random.uniform(k_xyz, (B, N, 3), jnp.float32)
    points = jax.random.normal(k_pts, (B, N, D), jnp.float32)

    module = PointnetSAMSG(npoint, radius_list, nsample_list, D, mlp_list, k_param)
    new_xyz, new_points = module(xyz, points)
    jax.block_until_ready((new_xyz, new_points))

    assert new_xyz.shape == (B, npoint, 3)
    assert new_points.shape == (B, npoint, sum(m[-1] for m in mlp_list))
    print("KERNEL_OK")
</pallas_src>

<mosaic_0001>
module attributes {stable_mosaic.version = 11 : i64} {
  func.func @kernel(%arg0: i32, %arg1: i32, %arg2: memref<1x7x64xbf16, #tpu.memory_space<vmem>>, %arg3: memref<16x7xbf16, #tpu.memory_space<vmem>>, %arg4: memref<16x1xf32, #tpu.memory_space<vmem>>, %arg5: memref<32x16xbf16, #tpu.memory_space<vmem>>, %arg6: memref<32x1xf32, #tpu.memory_space<vmem>>, %arg7: memref<1x7x128xbf16, #tpu.memory_space<vmem>>, %arg8: memref<16x7xbf16, #tpu.memory_space<vmem>>, %arg9: memref<16x1xf32, #tpu.memory_space<vmem>>, %arg10: memref<32x16xbf16, #tpu.memory_space<vmem>>, %arg11: memref<32x1xf32, #tpu.memory_space<vmem>>, %arg12: memref<1x64x8xf32, #tpu.memory_space<vmem>>) attributes {dimension_semantics = [#tpu.dimension_semantics<parallel>, #tpu.dimension_semantics<parallel>], iteration_bounds = array<i64: 2, 1>, scalar_prefetch = 0 : i64, scratch_operands = 0 : i64, tpu.core_type = #tpu.core_type<tc>, window_params = [{transform_indices = @transform_0, window_bounds = array<i64: 1, 7, 64>}, {pipeline_mode = #tpu.pipeline_mode<synchronous>, transform_indices = @transform_1, window_bounds = array<i64: 16, 7>}, {pipeline_mode = #tpu.pipeline_mode<synchronous>, transform_indices = @transform_2, window_bounds = array<i64: 16, 1>}, {pipeline_mode = #tpu.pipeline_mode<synchronous>, transform_indices = @transform_3, window_bounds = array<i64: 32, 16>}, {pipeline_mode = #tpu.pipeline_mode<synchronous>, transform_indices = @transform_4, window_bounds = array<i64: 32, 1>}, {transform_indices = @transform_5, window_bounds = array<i64: 1, 7, 128>}, {pipeline_mode = #tpu.pipeline_mode<synchronous>, transform_indices = @transform_6, window_bounds = array<i64: 16, 7>}, {pipeline_mode = #tpu.pipeline_mode<synchronous>, transform_indices = @transform_7, window_bounds = array<i64: 16, 1>}, {pipeline_mode = #tpu.pipeline_mode<synchronous>, transform_indices = @transform_8, window_bounds = array<i64: 32, 16>}, {pipeline_mode = #tpu.pipeline_mode<synchronous>, transform_indices = @transform_9, window_bounds = array<i64: 32, 1>}, {transform_indices = @transform_10, window_bounds = array<i64: 1, 64, 8>}]} {
    %c0 = arith.constant 0 : index
    %c0_0 = arith.constant 0 : index
    %c0_1 = arith.constant 0 : index
    %0 = vector.load %arg2[%c0, %c0_0, %c0_1] : memref<1x7x64xbf16, #tpu.memory_space<vmem>>, vector<1x7x64xbf16>
    %1 = vector.shape_cast %0 : vector<1x7x64xbf16> to vector<7x64xbf16>
    %c0_2 = arith.constant 0 : index
    %c0_3 = arith.constant 0 : index
    %2 = vector.load %arg3[%c0_2, %c0_3] : memref<16x7xbf16, #tpu.memory_space<vmem>>, vector<16x7xbf16>
    %c0_4 = arith.constant 0 : index
    %c0_5 = arith.constant 0 : index
    %3 = vector.load %arg4[%c0_4, %c0_5] : memref<16x1xf32, #tpu.memory_space<vmem>>, vector<16x1xf32>
    %cst = arith.constant dense<0.000000e+00> : vector<16x64xf32>
    %4 = tpu.matmul %2, %1, %cst {dimension_numbers = #tpu.dot_dimension_numbers<[1], [0], [0], [1], [0, 0, 1, 1], [], []>} : vector<16x7xbf16>, vector<7x64xbf16>, vector<16x64xf32> -> vector<16x64xf32>
    %5 = vector.broadcast %3 : vector<16x1xf32> to vector<16x64xf32>
    %6 = arith.addf %4, %5 : vector<16x64xf32>
    %cst_6 = arith.constant 0.00999999977 : f32
    %7 = vector.broadcast %cst_6 : f32 to vector<16x64xf32>
    %8 = arith.mulf %7, %6 : vector<16x64xf32>
    %9 = arith.maximumf %6, %8 : vector<16x64xf32>
    %10 = arith.truncf %9 : vector<16x64xf32> to vector<16x64xbf16>
    %c0_7 = arith.constant 0 : index
    %c0_8 = arith.constant 0 : index
    %11 = vector.load %arg5[%c0_7, %c0_8] : memref<32x16xbf16, #tpu.memory_space<vmem>>, vector<32x16xbf16>
    %c0_9 = arith.constant 0 : index
    %c0_10 = arith.constant 0 : index
    %12 = vector.load %arg6[%c0_9, %c0_10] : memref<32x1xf32, #tpu.memory_space<vmem>>, vector<32x1xf32>
    %cst_11 = arith.constant dense<0.000000e+00> : vector<32x64xf32>
    %13 = tpu.matmul %11, %10, %cst_11 {dimension_numbers = #tpu.dot_dimension_numbers<[1], [0], [0], [1], [0, 0, 1, 1], [], []>} : vector<32x16xbf16>, vector<16x64xbf16>, vector<32x64xf32> -> vector<32x64xf32>
    %14 = vector.broadcast %12 : vector<32x1xf32> to vector<32x64xf32>
    %15 = arith.addf %13, %14 : vector<32x64xf32>
    %cst_12 = arith.constant 0.00999999977 : f32
    %16 = vector.broadcast %cst_12 : f32 to vector<32x64xf32>
    %17 = arith.mulf %16, %15 : vector<32x64xf32>
    %18 = arith.maximumf %15, %17 : vector<32x64xf32>
    %19 = vector.extract_strided_slice %18 {offsets = [0, 0], sizes = [32, 8], strides = [1, 1]} : vector<32x64xf32> to vector<32x8xf32>
    %20 = vector.extract_strided_slice %18 {offsets = [0, 8], sizes = [32, 8], strides = [1, 1]} : vector<32x64xf32> to vector<32x8xf32>
    %21 = vector.extract_strided_slice %18 {offsets = [0, 16], sizes = [32, 8], strides = [1, 1]} : vector<32x64xf32> to vector<32x8xf32>
    %22 = vector.extract_strided_slice %18 {offsets = [0, 24], sizes = [32, 8], strides = [1, 1]} : vector<32x64xf32> to vector<32x8xf32>
    %23 = vector.extract_strided_slice %18 {offsets = [0, 32], sizes = [32, 8], strides = [1, 1]} : vector<32x64xf32> to vector<32x8xf32>
    %24 = vector.extract_strided_slice %18 {offsets = [0, 40], sizes = [32, 8], strides = [1, 1]} : vector<32x64xf32> to vector<32x8xf32>
    %25 = vector.extract_strided_slice %18 {offsets = [0, 48], sizes = [32, 8], strides = [1, 1]} : vector<32x64xf32> to vector<32x8xf32>
    %26 = vector.extract_strided_slice %18 {offsets = [0, 56], sizes = [32, 8], strides = [1, 1]} : vector<32x64xf32> to vector<32x8xf32>
    %27 = arith.maximumf %19, %20 : vector<32x8xf32>
    %28 = arith.maximumf %21, %22 : vector<32x8xf32>
    %29 = arith.maximumf %23, %24 : vector<32x8xf32>
    %30 = arith.maximumf %25, %26 : vector<32x8xf32>
    %31 = arith.maximumf %27, %28 : vector<32x8xf32>
    %32 = arith.maximumf %29, %30 : vector<32x8xf32>
    %33 = arith.maximumf %31, %32 : vector<32x8xf32>
    %c0_13 = arith.constant 0 : index
    %c0_14 = arith.constant 0 : index
    %c0_15 = arith.constant 0 : index
    %34 = vector.load %arg12[%c0_13, %c0_14, %c0_15] : memref<1x64x8xf32, #tpu.memory_space<vmem>>, vector<1x32x8xf32>
    %35 = vector.shape_cast %34 : vector<1x32x8xf32> to vector<32x8xf32>
    %36 = vector.shape_cast %33 : vector<32x8xf32> to vector<1x32x8xf32>
    tpu.vector_store %arg12[%c0_13, %c0_14, %c0_15], %36 {strides = array<i32>} : memref<1x64x8xf32, #tpu.memory_space<vmem>>, vector<1x32x8xf32>,
    %c0_16 = arith.constant 0 : index
    %c0_17 = arith.constant 0 : index
    %c0_18 = arith.constant 0 : index
    %37 = vector.load %arg7[%c0_16, %c0_17, %c0_18] : memref<1x7x128xbf16, #tpu.memory_space<vmem>>, vector<1x7x128xbf16>
    %38 = vector.shape_cast %37 : vector<1x7x128xbf16> to vector<7x128xbf16>
    %c0_19 = arith.constant 0 : index
    %c0_20 = arith.constant 0 : index
    %39 = vector.load %arg8[%c0_19, %c0_20] : memref<16x7xbf16, #tpu.memory_space<vmem>>, vector<16x7xbf16>
    %c0_21 = arith.constant 0 : index
    %c0_22 = arith.constant 0 : index
    %40 = vector.load %arg9[%c0_21, %c0_22] : memref<16x1xf32, #tpu.memory_space<vmem>>, vector<16x1xf32>
    %cst_23 = arith.constant dense<0.000000e+00> : vector<16x128xf32>
    %41 = tpu.matmul %39, %38, %cst_23 {dimension_numbers = #tpu.dot_dimension_numbers<[1], [0], [0], [1], [0, 0, 1, 1], [], []>} : vector<16x7xbf16>, vector<7x128xbf16>, vector<16x128xf32> -> vector<16x128xf32>
    %42 = vector.broadcast %40 : vector<16x1xf32> to vector<16x128xf32>
    %43 = arith.addf %41, %42 : vector<16x128xf32>
    %cst_24 = arith.constant 0.00999999977 : f32
    %44 = vector.broadcast %cst_24 : f32 to vector<16x128xf32>
    %45 = arith.mulf %44, %43 : vector<16x128xf32>
    %46 = arith.maximumf %43, %45 : vector<16x128xf32>
    %47 = arith.truncf %46 : vector<16x128xf32> to vector<16x128xbf16>
    %c0_25 = arith.constant 0 : index
    %c0_26 = arith.constant 0 : index
    %48 = vector.load %arg10[%c0_25, %c0_26] : memref<32x16xbf16, #tpu.memory_space<vmem>>, vector<32x16xbf16>
    %c0_27 = arith.constant 0 : index
    %c0_28 = arith.constant 0 : index
    %49 = vector.load %arg11[%c0_27, %c0_28] : memref<32x1xf32, #tpu.memory_space<vmem>>, vector<32x1xf32>
    %cst_29 = arith.constant dense<0.000000e+00> : vector<32x128xf32>
    %50 = tpu.matmul %48, %47, %cst_29 {dimension_numbers = #tpu.dot_dimension_numbers<[1], [0], [0], [1], [0, 0, 1, 1], [], []>} : vector<32x16xbf16>, vector<16x128xbf16>, vector<32x128xf32> -> vector<32x128xf32>
    %51 = vector.broadcast %49 : vector<32x1xf32> to vector<32x128xf32>
    %52 = arith.addf %50, %51 : vector<32x128xf32>
    %cst_30 = arith.constant 0.00999999977 : f32
    %53 = vector.broadcast %cst_30 : f32 to vector<32x128xf32>
    %54 = arith.mulf %53, %52 : vector<32x128xf32>
    %55 = arith.maximumf %52, %54 : vector<32x128xf32>
    %56 = vector.extract_strided_slice %55 {offsets = [0, 0], sizes = [32, 8], strides = [1, 1]} : vector<32x128xf32> to vector<32x8xf32>
    %57 = vector.extract_strided_slice %55 {offsets = [0, 8], sizes = [32, 8], strides = [1, 1]} : vector<32x128xf32> to vector<32x8xf32>
    %58 = vector.extract_strided_slice %55 {offsets = [0, 16], sizes = [32, 8], strides = [1, 1]} : vector<32x128xf32> to vector<32x8xf32>
    %59 = vector.extract_strided_slice %55 {offsets = [0, 24], sizes = [32, 8], strides = [1, 1]} : vector<32x128xf32> to vector<32x8xf32>
    %60 = vector.extract_strided_slice %55 {offsets = [0, 32], sizes = [32, 8], strides = [1, 1]} : vector<32x128xf32> to vector<32x8xf32>
    %61 = vector.extract_strided_slice %55 {offsets = [0, 40], sizes = [32, 8], strides = [1, 1]} : vector<32x128xf32> to vector<32x8xf32>
    %62 = vector.extract_strided_slice %55 {offsets = [0, 48], sizes = [32, 8], strides = [1, 1]} : vector<32x128xf32> to vector<32x8xf32>
    %63 = vector.extract_strided_slice %55 {offsets = [0, 56], sizes = [32, 8], strides = [1, 1]} : vector<32x128xf32> to vector<32x8xf32>
    %64 = vector.extract_strided_slice %55 {offsets = [0, 64], sizes = [32, 8], strides = [1, 1]} : vector<32x128xf32> to vector<32x8xf32>
    %65 = vector.extract_strided_slice %55 {offsets = [0, 72], sizes = [32, 8], strides = [1, 1]} : vector<32x128xf32> to vector<32x8xf32>
    %66 = vector.extract_strided_slice %55 {offsets = [0, 80], sizes = [32, 8], strides = [1, 1]} : vector<32x128xf32> to vector<32x8xf32>
    %67 = vector.extract_strided_slice %55 {offsets = [0, 88], sizes = [32, 8], strides = [1, 1]} : vector<32x128xf32> to vector<32x8xf32>
    %68 = vector.extract_strided_slice %55 {offsets = [0, 96], sizes = [32, 8], strides = [1, 1]} : vector<32x128xf32> to vector<32x8xf32>
    %69 = vector.extract_strided_slice %55 {offsets = [0, 104], sizes = [32, 8], strides = [1, 1]} : vector<32x128xf32> to vector<32x8xf32>
    %70 = vector.extract_strided_slice %55 {offsets = [0, 112], sizes = [32, 8], strides = [1, 1]} : vector<32x128xf32> to vector<32x8xf32>
    %71 = vector.extract_strided_slice %55 {offsets = [0, 120], sizes = [32, 8], strides = [1, 1]} : vector<32x128xf32> to vector<32x8xf32>
    %72 = arith.maximumf %56, %57 : vector<32x8xf32>
    %73 = arith.maximumf %58, %59 : vector<32x8xf32>
    %74 = arith.maximumf %60, %61 : vector<32x8xf32>
    %75 = arith.maximumf %62, %63 : vector<32x8xf32>
    %76 = arith.maximumf %64, %65 : vector<32x8xf32>
    %77 = arith.maximumf %66, %67 : vector<32x8xf32>
    %78 = arith.maximumf %68, %69 : vector<32x8xf32>
    %79 = arith.maximumf %70, %71 : vector<32x8xf32>
    %80 = arith.maximumf %72, %73 : vector<32x8xf32>
    %81 = arith.maximumf %74, %75 : vector<32x8xf32>
    %82 = arith.maximumf %76, %77 : vector<32x8xf32>
    %83 = arith.maximumf %78, %79 : vector<32x8xf32>
    %84 = arith.maximumf %80, %81 : vector<32x8xf32>
    %85 = arith.maximumf %82, %83 : vector<32x8xf32>
    %86 = arith.maximumf %84, %85 : vector<32x8xf32>
    %c0_31 = arith.constant 0 : index
    %c32 = arith.constant 32 : index
    %c0_32 = arith.constant 0 : index
    %87 = vector.load %arg12[%c0_31, %c32, %c0_32] : memref<1x64x8xf32, #tpu.memory_space<vmem>>, vector<1x32x8xf32>
    %88 = vector.shape_cast %87 : vector<1x32x8xf32> to vector<32x8xf32>
    %89 = vector.shape_cast %86 : vector<32x8xf32> to vector<1x32x8xf32>
    tpu.vector_store %arg12[%c0_31, %c32, %c0_32], %89 {strides = array<i32>} : memref<1x64x8xf32, #tpu.memory_space<vmem>>, vector<1x32x8xf32>,
    return
  }
  func.func @transform_0(%arg0: i32, %arg1: i32) -> (i32, i32, i32) {
    %c0_i32 = arith.constant 0 : i32
    %c0_i32_0 = arith.constant 0 : i32
    return %arg0, %c0_i32, %arg1 : i32, i32, i32
  }
  func.func @transform_1(%arg0: i32, %arg1: i32) -> (i32, i32) {
    %c0_i32 = arith.constant 0 : i32
    %c0_i32_0 = arith.constant 0 : i32
    %c0_i32_1 = arith.constant 0 : i32
    return %c0_i32, %c0_i32_0 : i32, i32
  }
  func.func @transform_2(%arg0: i32, %arg1: i32) -> (i32, i32) {
    %c0_i32 = arith.constant 0 : i32
    %c0_i32_0 = arith.constant 0 : i32
    %c0_i32_1 = arith.constant 0 : i32
    return %c0_i32, %c0_i32_0 : i32, i32
  }
  func.func @transform_3(%arg0: i32, %arg1: i32) -> (i32, i32) {
    %c0_i32 = arith.constant 0 : i32
    %c0_i32_0 = arith.constant 0 : i32
    %c0_i32_1 = arith.constant 0 : i32
    return %c0_i32, %c0_i32_0 : i32, i32
  }
  func.func @transform_4(%arg0: i32, %arg1: i32) -> (i32, i32) {
    %c0_i32 = arith.constant 0 : i32
    %c0_i32_0 = arith.constant 0 : i32
    %c0_i32_1 = arith.constant 0 : i32
    return %c0_i32, %c0_i32_0 : i32, i32
  }
  func.func @transform_5(%arg0: i32, %arg1: i32) -> (i32, i32, i32) {
    %c0_i32 = arith.constant 0 : i32
    %c0_i32_0 = arith.constant 0 : i32
    return %arg0, %c0_i32, %arg1 : i32, i32, i32
  }
  func.func @transform_6(%arg0: i32, %arg1: i32) -> (i32, i32) {
    %c0_i32 = arith.constant 0 : i32
    %c0_i32_0 = arith.constant 0 : i32
    %c0_i32_1 = arith.constant 0 : i32
    return %c0_i32, %c0_i32_0 : i32, i32
  }
  func.func @transform_7(%arg0: i32, %arg1: i32) -> (i32, i32) {
    %c0_i32 = arith.constant 0 : i32
    %c0_i32_0 = arith.constant 0 : i32
    %c0_i32_1 = arith.constant 0 : i32
    return %c0_i32, %c0_i32_0 : i32, i32
  }
  func.func @transform_8(%arg0: i32, %arg1: i32) -> (i32, i32) {
    %c0_i32 = arith.constant 0 : i32
    %c0_i32_0 = arith.constant 0 : i32
    %c0_i32_1 = arith.constant 0 : i32
    return %c0_i32, %c0_i32_0 : i32, i32
  }
  func.func @transform_9(%arg0: i32, %arg1: i32) -> (i32, i32) {
    %c0_i32 = arith.constant 0 : i32
    %c0_i32_0 = arith.constant 0 : i32
    %c0_i32_1 = arith.constant 0 : i32
    return %c0_i32, %c0_i32_0 : i32, i32
  }
  func.func @transform_10(%arg0: i32, %arg1: i32) -> (i32, i32, i32) {
    %c0_i32 = arith.constant 0 : i32
    %c0_i32_0 = arith.constant 0 : i32
    return %arg0, %c0_i32, %arg1 : i32, i32, i32
  }
}

</mosaic_0001>

<bundles_post_ra>
// kernel: tpu_custom_call.1
= control target key start
LH: loop header
LB: loop body
LE: loop exit
PB: predicated region body
PF: predicated region fallthrough
CT: control target
= control target key end

     0   :  { %s1198_s13 = smov 0   ;;  %s1200_s14 = smov 0   ;;  %s1308_s0 = inlined_call_operand.vmem [shape: bf16[2,7,64], index: 0, kind: input, shape index: {}]   ;;  %s1309_s1 = inlined_call_operand.vmem [shape: bf16[16,7], index: 1, kind: input, shape index: {}]   ;;  %s1310_s2 = inlined_call_operand.vmem [shape: f32[16,1], index: 2, kind: input, shape index: {}]   ;;  %s1311_s3 = inlined_call_operand.vmem [shape: bf16[32,16], index: 3, kind: input, shape index: {}]   ;;  %s1312_s4 = inlined_call_operand.vmem [shape: f32[32,1], index: 4, kind: input, shape index: {}]   ;;  %s1313_s5 = inlined_call_operand.vmem [shape: bf16[2,7,128], index: 5, kind: input, shape index: {}]   ;;  %s1314_s6 = inlined_call_operand.vmem [shape: bf16[16,7], index: 6, kind: input, shape index: {}]   ;;  %s1315_s7 = inlined_call_operand.vmem [shape: f32[16,1], index: 7, kind: input, shape index: {}]   ;;  %s1316_s8 = inlined_call_operand.vmem [shape: bf16[32,16], index: 8, kind: input, shape index: {}]   ;;  %s1317_s9 = inlined_call_operand.vmem [shape: f32[32,1], index: 9, kind: input, shape index: {}]   ;;  %s1318_s10 = inlined_call_operand.vmem [shape: f32[2,64,8], index: 10, kind: output, shape index: {}]  }
   0x1   :  { %s1202_s15 = smov 0  }
   0x2 LB: > { %s32_s16 = sadd.s32 1, %s1129_s14  ;;  %p1017_p0 = scmp.ge.s32.totalorder %s1133_s15, 1  ;;  %s1133_s15 = sphi %s1202_s15, %s20_s15   ;;  %s1129_s14 = sphi %s1200_s14, %s1320_s14   ;;  %s1125_s13 = sphi %s1198_s13, %s1319_s13  }
   0x3   : > { %p34_p1 = scmp.ge.s32.totalorder %s32_s16, 2  ;;  %p344_p2 = scmp.lt.s32.totalorder %s1133_s15, 3 }
   0x5   : > { %s1322_s16 = smov (%p34_p1, %s32_s16), 0  ;;  %p345_p3 = pnand %p1017_p0, %p344_p2 }
   0x6   : > { %p394_p4 = scmp.lt.s32.totalorder (!%p345_p3), %s1125_s13, 1  ;;  %s1139_s28 = smov (!%p345_p3), 120  }
   0x7   : > { %348 = sbr.rel (%p345_p3) target bundleno = 916 (0x394), region = 60  ;;  %s1140_s29 = smov (!%p345_p3), 112  }
   0x8   : > { %s1141_s30 = smov (!%p345_p3), 96   ;;  %s1142_s11 = smov (!%p345_p3), 64  }
   0xc   : > { %vm441_vm0 = vcmask 1042432   ;;  %vm442_vm1 = vcmask 1043456   ;;  %v1135_v0 = vmov 0.0   ;;  %v1136_v1 = vmov 65535   ;;  %s1324_s13 = smov (!%p394_p4, %s1125_s13), 1  ;;  %v420_v3 = vld [vmem:[%s1310_s2] sm:$0xff] }
   0xd   : > { %1047 = vmatprep.subr.bf16.mxu0 %v1135_v0  ;;  %v443_v2 = vsel %vm441_vm0, 4294967295, %v1136_v1  ;;  %vm1137_vm2 = vmmov 0   ;;  %v664_v4 = vld [vmem:[%s1315_s7] sm:$0xff]  ;;  %s1018_s21 = sshll.u32 %s1324_s13, 2  ;;  %v1138_v6 = vmov 0   ;;  %v421_v9 = vld [vmem:[%s1310_s2 + $0x8] sm:$0xff] }
   0xe   : > { %1049 = vmatprep.mubr.msk.bf16.mxu0 %vm1137_vm2, %v1135_v0  ;;  %v444_v5 = vsel %vm442_vm1, %v443_v2, 0  ;;  %1103 = vset.pattern.permute.xlu0 %v1138_v6  ;;  %s400_s24 = scalar_lea.vmem %s1308_s0, %s1018_s21  ;;  %s407_s27 = scalar_lea.vmem %s1313_s5, %s1018_s21  ;;  %v1105_v11 = vld [vmem:[%s1309_s1] sm:$0xff]   ;;  %vm437_vm3 = vcmask 56320   ;;  %v665_v12 = vld [vmem:[%s1315_s7 + $0x8] sm:$0xff]  ;;  %v739_v16 = vld [vmem:[%s1317_s9 + $0x10] sm:$0xff]  ;;  %vm532_vm4 = vcmask 130048  }
   0xf   : > { %1104 = vset.pattern.permute.xlu1 %v1138_v6  ;;  %424 = vperm.xlu0 %1103, %v420_v3   ;;  %v417_v7 = vld [vmem:[%s400_s24] sm:$0xf]  ;;  %v738_v15 = vld [vmem:[%s1317_s9 + $0x8] sm:$0xff]  ;;  %v740_v17 = vld [vmem:[%s1317_s9 + $0x18] sm:$0xff]  ;;  %s1036_s12 = sshll.u32 %s1324_s13, 6  ;;  %vm656_vm5 = vcmask 64512  }
  0x10   : > { %668 = vperm.xlu1 %1104, %v664_v4   ;;  %v661_v8 = vld [vmem:[%s407_s27] sm:$0xf]  ;;  %v446_v10 = vand.u32 %v444_v5, %v417_v7  ;;  %v499_v20 = vld [vmem:[%s1312_s4 + $0x8] sm:$0xff]  ;;  %v500_v21 = vld [vmem:[%s1312_s4 + $0x10] sm:$0xff]  ;;  %s415_s19 = scalar_lea.vmem %s1318_s10, %s1036_s12 }
  0x11   : > { %v685_v13 = vand.u32 %v661_v8, %v444_v5  ;;  %v737_v14 = vld [vmem:[%s1317_s9] sm:$0xff]  ;;  %v501_v22 = vld [vmem:[%s1312_s4 + $0x18] sm:$0xff]  ;;  %v1108_v45 = vld [vmem:[%s1311_s3 + $0x8] sm:$0xff]  }
  0x12   : > { %1048 = vmatpush3.bf16.msra.mxu0 %v446_v10  ;;  %v1106_v18 = vld [vmem:[%s1314_s6] sm:$0xff]   ;;  %v1110_v52 = vld [vmem:[%s1316_s8 + $0x8] sm:$0xff]  }
  0x13   : > { %429 = vperm.xlu0 %1103, %v421_v9   ;;  %1059 = vmatprep.subr.bf16.mxu0 %v1135_v0  ;;  %v498_v19 = vld [vmem:[%s1312_s4] sm:$0xff] }
  0x14   : > { %673 = vperm.xlu1 %1104, %v665_v12   ;;  %v1107_v23 = vld [vmem:[%s1311_s3] sm:$0xff]  }
  0x15   : > { %1050 = vmatmul.mubr.msk.bf16.vlgmr.msra.gmra.mxu0 %vm437_vm3, %v1105_v11  ;;  %1055 = vmatprep.mubr.msk.bf16.mxu1 %vm532_vm4, %v1107_v23  ;;  %v1109_v47 = vld [vmem:[%s1316_s8] sm:$0xff]  }
  0x16   : > { %1060 = vmatpush3.bf16.msra.mxu0 %v685_v13  ;;  %1061 = vmatprep.mubr.msk.bf16.mxu0 %vm1137_vm2, %v1135_v0 }
  0x17   : > { %743 = vperm.xlu0 %1103, %v737_v14  }
  0x18   : > { %748 = vperm.xlu1 %1104, %v738_v15  }
  0x1b   : > { %753 = vperm.xlu0 %1103, %v739_v16  }
  0x1c   : > { %758 = vperm.xlu1 %1104, %v740_v17  }
  0x1d   : > { %1062 = vmatmul.mubr.msk.bf16.vlgmr.msra.gmra.mxu0 %vm437_vm3, %v1106_v18 }
  0x1f   : > { %504 = vperm.xlu0 %1103, %v498_v19  }
  0x20   : > { %509 = vperm.xlu1 %1104, %v499_v20  }
  0x23   : > { %514 = vperm.xlu0 %1103, %v500_v21  }
  0x24   : > { %519 = vperm.xlu1 %1104, %v501_v22  }
  0x8a   : > { %v425_v24 = vpop.permute.xlu0 %424 }
  0x8b   : > { %v669_v32 = vpop.permute.xlu1 %668 }
  0x8e   : > { %v430_v28 = vpop.permute.xlu0 %429 }
  0x8f   : > { %v674_v41 = vpop.permute.xlu1 %673 }
  0x92   : > { %v744_v53 = vpop.permute.xlu0 %743 }
  0x93   : > { %v749_v56 = vpop.permute.xlu1 %748 }
  0x96   : > { %v754_v58 = vpop.permute.xlu0 %753 }
  0x97   : > { %v759_v61 = vpop.permute.xlu1 %758 }
  0x9a   : > { %v505_v63 = vpop.permute.xlu0 %504 }
  0x9b   : > { %v510_v10 = vpop.permute.xlu1 %509 }
  0x9e   : > { %v515_v11 = vpop.permute.xlu0 %514 }
  0x9f   : > { %v520_v19 = vpop.permute.xlu1 %519 }
  0xd5   : > { %v482_v25 = vpop.f32.mrf.mxu0 }
  0xd6   : > { %v483_v26 = vadd.f32 %v482_v25, %v425_v24 }
  0xd7   : > { %v1051_v27 = vpop.f32.mrf.mxu0 }
  0xd8   : > { %v489_v30 = vmul.f32 0.01, %v483_v26 }
  0xd9   : > { %v485_v29 = vpop.f32.mrf.mxu0 }
  0xda   : > { %v486_v31 = vadd.f32 %v485_v29, %v430_v28  ;;  %v491_v36 = vmax.f32 %v483_v26, %v489_v30 }
  0xdb   : > { %v1052_v33 = vpop.f32.mrf.mxu0 }
  0xdc   : > { %v490_v34 = vmul.f32 0.01, %v486_v31 }
  0xdd   : > { %v721_v35 = vpop.f32.mrf.mxu0 }
  0xde   : > { %v492_v37 = vmax.f32 %v486_v31, %v490_v34  ;;  %v722_v38 = vadd.f32 %v721_v35, %v669_v32 }
  0xdf   : > { %v1063_v39 = vpop.f32.mrf.mxu0 }
  0xe0   : > { %v493_v40 = vpack.c.bf16 %v492_v37, %v491_v36  ;;  %v728_v43 = vmul.f32 0.01, %v722_v38 }
  0xe1   : > { %v724_v42 = vpop.f32.mrf.mxu0 }
  0xe2   : > { %v725_v44 = vadd.f32 %v724_v42, %v674_v41  ;;  %1053 = vmatprep.subr.bf16.mxu1 %v493_v40  ;;  %v730_v49 = vmax.f32 %v722_v38, %v728_v43 }
  0xe3   : > { %1054 = vmatpush3.bf16.msra.mxu1 %v493_v40  ;;  %v1064_v46 = vpop.f32.mrf.mxu0 }
  0xe4   : > { %v729_v48 = vmul.f32 0.01, %v725_v44 }
  0xe6   : > { %v731_v50 = vmax.f32 %v725_v44, %v729_v48  ;;  %1056 = vmatmul.mubr.msk.bf16.vlgmr.msra.gmra.mxu1 %vm532_vm4, %v1108_v45 }
  0xe7   : > { %1067 = vmatprep.mubr.msk.bf16.mxu1 %vm532_vm4, %v1109_v47 }
  0xe8   : > { %v732_v51 = vpack.c.bf16 %v731_v50, %v730_v49 }
  0xea   : > { %1065 = vmatprep.subr.bf16.mxu1 %v732_v51 }
  0xeb   : > { %1066 = vmatpush3.bf16.msra.mxu1 %v732_v51 }
  0xee   : > { %1068 = vmatmul.mubr.msk.bf16.vlgmr.msra.gmra.mxu1 %vm532_vm4, %v1110_v52 }
 0x1a6   : > { %v1057_v54 = vpop.f32.mrf.mxu1 }
 0x1a7   : > { %v582_v13 = vadd.f32 %v1057_v54, %v515_v11 }
 0x1a8   : > { %v573_v55 = vpop.f32.mrf.mxu1 }
 0x1a9   : > { %v574_v4 = vadd.f32 %v573_v55, %v505_v63  ;;  %v590_v20 = vmul.f32 0.01, %v582_v13 }
 0x1aa   : > { %v1058_v57 = vpop.f32.mrf.mxu1 }
 0x1ab   : > { %v588_v14 = vmul.f32 0.01, %v574_v4  ;;  %v585_v22 = vadd.f32 %v1058_v57, %v520_v19  ;;  %v594_v25 = vmax.f32 %v582_v13, %v590_v20 }
 0x1ac   : > { %v576_v59 = vpop.f32.mrf.mxu1 }
 0x1ad   : > { %v577_v15 = vadd.f32 %v576_v59, %v510_v10  ;;  %v592_v21 = vmax.f32 %v574_v4, %v588_v14  ;;  %v591_v26 = vmul.f32 0.01, %v585_v22 }
 0x1ae   : > { %v1069_v60 = vpop.f32.mrf.mxu1 }
 0x1af   : > { %v820_v0 = vadd.f32 %v1069_v60, %v754_v58  ;;  %v589_v23 = vmul.f32 0.01, %v577_v15  ;;  %v595_v28 = vmax.f32 %v585_v22, %v591_v26 }
 0x1b0   : > { %v811_v62 = vpop.f32.mrf.mxu1 }
 0x1b1   : > { %v812_v1 = vadd.f32 %v811_v62, %v744_v53  ;;  %v828_v6 = vmul.f32 0.01, %v820_v0  ;;  %v593_v27 = vmax.f32 %v577_v15, %v589_v23 }
 0x1b2   : > { %v1070_v2 = vpop.f32.mrf.mxu1 }
 0x1b3   : > { %v826_v3 = vmul.f32 0.01, %v812_v1  ;;  %v823_v8 = vadd.f32 %v1070_v2, %v759_v61  ;;  %v832_v16 = vmax.f32 %v820_v0, %v828_v6 }
 0x1b4   : > { %v814_v5 = vpop.f32.mrf.mxu1 }
 0x1b5   : > { %v830_v7 = vmax.f32 %v812_v1, %v826_v3  ;;  %v815_v9 = vadd.f32 %v814_v5, %v749_v56  ;;  %v829_v17 = vmul.f32 0.01, %v823_v8 }
 0x1b7   : > { %v827_v12 = vmul.f32 0.01, %v815_v9  ;;  %838 = vrot.lane.b32.xlu0 %v830_v7, %s1139_s28  ;;  %v833_v24 = vmax.f32 %v823_v8, %v829_v17 }
 0x1b9   : > { %v831_v18 = vmax.f32 %v815_v9, %v827_v12 }
 0x1bb   : > { %840 = vrot.lane.b32.xlu1 %v831_v18, %s1139_s28  ;;  %842 = vrot.lane.b32.xlu0 %v832_v16, %s1139_s28 }
 0x1bf   : > { %844 = vrot.lane.b32.xlu1 %v833_v24, %s1139_s28  ;;  %600 = vrot.lane.b32.xlu0 %v592_v21, %s1139_s28 }
 0x1c3   : > { %602 = vrot.lane.b32.xlu1 %v593_v27, %s1139_s28  ;;  %604 = vrot.lane.b32.xlu0 %v594_v25, %s1139_s28 }
 0x1c7   : > { %606 = vrot.lane.b32.xlu1 %v595_v28, %s1139_s28 }
 0x229   : > { %v839_v29 = vpop.permute.xlu0 %838 }
 0x22a   : > { %v850_v30 = vmax.f32 %v830_v7, %v839_v29 }
 0x22c   : > { %858 = vrot.lane.b32.xlu0 %v850_v30, %s1140_s29 }
 0x22d   : > { %v841_v31 = vpop.permute.xlu1 %840  ;;  %v843_v32 = vpop.permute.xlu0 %842 }
 0x22e   : > { %v851_v33 = vmax.f32 %v831_v18, %v841_v31  ;;  %v852_v34 = vmax.f32 %v832_v16, %v843_v32 }
 0x230   : > { %860 = vrot.lane.b32.xlu1 %v851_v33, %s1140_s29  ;;  %862 = vrot.lane.b32.xlu0 %v852_v34, %s1140_s29 }
 0x231   : > { %v845_v35 = vpop.permute.xlu1 %844  ;;  %v601_v36 = vpop.permute.xlu0 %600 }
 0x232   : > { %v853_v37 = vmax.f32 %v833_v24, %v845_v35  ;;  %v612_v38 = vmax.f32 %v592_v21, %v601_v36 }
 0x234   : > { %864 = vrot.lane.b32.xlu1 %v853_v37, %s1140_s29  ;;  %620 = vrot.lane.b32.xlu0 %v612_v38, %s1140_s29 }
 0x235   : > { %v603_v39 = vpop.permute.xlu1 %602  ;;  %v605_v40 = vpop.permute.xlu0 %604 }
 0x236   : > { %v613_v41 = vmax.f32 %v593_v27, %v603_v39  ;;  %v614_v42 = vmax.f32 %v594_v25, %v605_v40 }
 0x238   : > { %622 = vrot.lane.b32.xlu1 %v613_v41, %s1140_s29  ;;  %624 = vrot.lane.b32.xlu0 %v614_v42, %s1140_s29 }
 0x239   : > { %v607_v43 = vpop.permute.xlu1 %606 }
 0x23a   : > { %v615_v44 = vmax.f32 %v595_v28, %v607_v43 }
 0x23c   : > { %626 = vrot.lane.b32.xlu1 %v615_v44, %s1140_s29 }
 0x29e   : > { %v859_v45 = vpop.permute.xlu0 %858 }
 0x29f   : > { %v870_v46 = vmax.f32 %v850_v30, %v859_v45 }
 0x2a1   : > { %878 = vrot.lane.b32.xlu0 %v870_v46, %s1141_s30 }
 0x2a2   : > { %v861_v47 = vpop.permute.xlu1 %860  ;;  %v863_v48 = vpop.permute.xlu0 %862 }
 0x2a3   : > { %v871_v49 = vmax.f32 %v851_v33, %v861_v47  ;;  %v872_v50 = vmax.f32 %v852_v34, %v863_v48 }
 0x2a5   : > { %880 = vrot.lane.b32.xlu1 %v871_v49, %s1141_s30  ;;  %882 = vrot.lane.b32.xlu0 %v872_v50, %s1141_s30 }
 0x2a6   : > { %v865_v51 = vpop.permute.xlu1 %864  ;;  %v621_v52 = vpop.permute.xlu0 %620 }
 0x2a7   : > { %v873_v53 = vmax.f32 %v853_v37, %v865_v51  ;;  %v632_v54 = vmax.f32 %v612_v38, %v621_v52 }
 0x2a9   : > { %884 = vrot.lane.b32.xlu1 %v873_v53, %s1141_s30  ;;  %640 = vrot.lane.b32.xlu0 %v632_v54, %s1141_s30 }
 0x2aa   : > { %v623_v55 = vpop.permute.xlu1 %622  ;;  %v625_v56 = vpop.permute.xlu0 %624 }
 0x2ab   : > { %v633_v57 = vmax.f32 %v613_v41, %v623_v55  ;;  %v634_v58 = vmax.f32 %v614_v42, %v625_v56 }
 0x2ad   : > { %642 = vrot.lane.b32.xlu1 %v633_v57, %s1141_s30  ;;  %644 = vrot.lane.b32.xlu0 %v634_v58, %s1141_s30 }
 0x2ae   : > { %v627_v59 = vpop.permute.xlu1 %626 }
 0x2af   : > { %v635_v60 = vmax.f32 %v615_v44, %v627_v59 }
 0x2b1   : > { %646 = vrot.lane.b32.xlu1 %v635_v60, %s1141_s30 }
 0x313   : > { %v879_v61 = vpop.permute.xlu0 %878 }
 0x314   : > { %v890_v62 = vmax.f32 %v870_v46, %v879_v61 }
 0x316   : > { %898 = vrot.lane.b32.xlu0 %v890_v62, %s1142_s11 }
 0x317   : > { %v881_v63 = vpop.permute.xlu1 %880  ;;  %v883_v0 = vpop.permute.xlu0 %882 }
 0x318   : > { %v891_v1 = vmax.f32 %v871_v49, %v881_v63  ;;  %v892_v2 = vmax.f32 %v872_v50, %v883_v0 }
 0x31a   : > { %900 = vrot.lane.b32.xlu1 %v891_v1, %s1142_s11  ;;  %902 = vrot.lane.b32.xlu0 %v892_v2, %s1142_s11 }
 0x31b   : > { %v885_v3 = vpop.permute.xlu1 %884  ;;  %v641_v4 = vpop.permute.xlu0 %640 }
 0x31c   : > { %v893_v5 = vmax.f32 %v873_v53, %v885_v3  ;;  %v652_v6 = vmax.f32 %v632_v54, %v641_v4 }
 0x31e   : > { %657 = vst.msk [vmem:[%s415_s19] sm:$0xff] %vm656_vm5, %v652_v6  ;;  %904 = vrot.lane.b32.xlu1 %v893_v5, %s1142_s11 }
 0x31f   : > { %v643_v7 = vpop.permute.xlu1 %642  ;;  %v645_v8 = vpop.permute.xlu0 %644 }
 0x320   : > { %v653_v9 = vmax.f32 %v633_v57, %v643_v7  ;;  %v654_v10 = vmax.f32 %v634_v58, %v645_v8 }
 0x322   : > { %658 = vst.msk [vmem:[%s415_s19 + $0x8] sm:$0xff] %vm656_vm5, %v653_v9  ;;  %659 = vst.msk [vmem:[%s415_s19 + $0x10] sm:$0xff] %vm656_vm5, %v654_v10 }
 0x323   : > { %v647_v11 = vpop.permute.xlu1 %646 }
 0x324   : > { %v655_v12 = vmax.f32 %v635_v60, %v647_v11 }
 0x326   : > { %660 = vst.msk [vmem:[%s415_s19 + $0x18] sm:$0xff] %vm656_vm5, %v655_v12 }
 0x388   : > { %v899_v13 = vpop.permute.xlu0 %898 }
 0x389   : > { %v910_v14 = vmax.f32 %v890_v62, %v899_v13 }
 0x38b   : > { %914 = vst.msk [vmem:[%s415_s19 + $0x20] sm:$0xff] %vm656_vm5, %v910_v14 }
 0x38c   : > { %v901_v15 = vpop.permute.xlu1 %900  ;;  %v903_v16 = vpop.permute.xlu0 %902 }
 0x38d   : > { %v911_v17 = vmax.f32 %v891_v1, %v901_v15  ;;  %v912_v18 = vmax.f32 %v892_v2, %v903_v16 }
 0x38f   : > { %915 = vst.msk [vmem:[%s415_s19 + $0x28] sm:$0xff] %vm656_vm5, %v911_v17  ;;  %916 = vst.msk [vmem:[%s415_s19 + $0x30] sm:$0xff] %vm656_vm5, %v912_v18 }
 0x390   : > { %v905_v19 = vpop.permute.xlu1 %904 }
 0x391   : > { %v913_v20 = vmax.f32 %v893_v5, %v905_v19 }
 0x393   : > { %917 = vst.msk [vmem:[%s415_s19 + $0x38] sm:$0xff] %vm656_vm5, %v913_v20 }
 0x394 PF: > { %s20_s15 = sadd.s32 1, %s1133_s15   ;;  %s1319_s13 = smov %s1129_s14 }
 0x395   : > { %p17_p5 = scmp.ge.s32.totalorder %s20_s15, 4   ;;  %s1320_s14 = smov %s1322_s16 }
 0x397   :  { %19 = sbr.rel (!%p17_p5) target bundleno = 2 (0x2), region = 93 }

</bundles_post_ra>
